<compile_context>
chip_gen: v6e
topology: v6e:2x2x1
jax: 0.10.0
libtpu: 0.0.40
codegen_flags: <defaults>
</compile_context>

<pallas_src>
import functools

import jax
import jax.numpy as jnp
from jax.experimental import pallas as pl
from jax.experimental.pallas import tpu as pltpu

_EPS = 1e-8  # matches torch.nn.functional.cosine_similarity default eps
_FALLBACK_VMEM_BYTES = 64 * 1024 * 1024  # v7x physical (smallest current gen)


def _vmem_capacity_bytes() -> int:
    try:
        return int(pltpu.get_tpu_info().vmem_capacity_bytes)
    except Exception:
        return _FALLBACK_VMEM_BYTES


def _choose_tile_rows(B: int, D: int, itemsize: int) -> int:
    """Biggest sublane-aligned batch tile whose pipelined footprint fits VMEM."""
    vmem = _vmem_capacity_bytes()
    # Pipelined input footprint: 3 inputs x 2 buffers x TB x D x itemsize.
    # Keep well under physical VMEM so layout padding / scratch has headroom.
    budget = min(vmem // 2, 32 * 1024 * 1024)
    tb = budget // (3 * 2 * D * itemsize)
    tb = min(tb, 1024)          # diminishing returns past ~512-1024 rows
    tb = (tb // 8) * 8          # sublane alignment
    if tb <= 0:
        tb = 8
    if tb >= B:
        return B                # single full-array block is always legal
    return tb


def _triplet_kernel(a_ref, p_ref, n_ref, out_ref, *, margin, batch, tile_rows):
    """Accumulate sum of relu(neg - pos + margin) over valid rows; finish with /B."""
    i = pl.program_id(0)

    @pl.when(i == 0)
    def _():
        out_ref[...] = jnp.zeros_like(out_ref)

    a = a_ref[...].astype(jnp.float32)
    p = p_ref[...].astype(jnp.float32)
    n = n_ref[...].astype(jnp.float32)

    # Row-wise squared norms and dot products (lane-axis reductions -> XLU).
    asq = jnp.sum(a * a, axis=1, keepdims=True)
    psq = jnp.sum(p * p, axis=1, keepdims=True)
    nsq = jnp.sum(n * n, axis=1, keepdims=True)
    ap = jnp.sum(a * p, axis=1, keepdims=True)
    an = jnp.sum(a * n, axis=1, keepdims=True)

    # cos = dot * rsqrt(max(||x||^2 ||y||^2, eps^2))  ==  dot / max(||x|| ||y||, eps)
    # (exact identity for nonnegative args; rsqrt goes to the idle EUP slot).
    eps2 = jnp.float32(_EPS * _EPS)
    pos = ap * jax.lax.rsqrt(jnp.maximum(asq * psq, eps2))
    neg = an * jax.lax.rsqrt(jnp.maximum(asq * nsq, eps2))

    loss = jnp.maximum(neg - pos + jnp.float32(margin), 0.0)  # (TB, 1)

    # Mask rows past the true batch size (final partial tile); otherwise each
    # padded row would contribute relu(0 - 0 + margin) = margin to the mean.
    row = jax.lax.broadcasted_iota(jnp.int32, loss.shape, 0)
    valid = (i * tile_rows + row) < batch
    loss = jnp.where(valid, loss, 0.0)

    out_ref[...] += jnp.sum(loss, axis=0, keepdims=True)  # (1, 1)

    @pl.when(i == pl.num_programs(0) - 1)
    def _():
        out_ref[...] = out_ref[...] * jnp.float32(1.0 / batch)


def triplet_loss(anchor, positive, negative, margin=0.5, tile_rows=None):
    """Pallas TPU implementation of TripletLoss.forward. Returns an f32 scalar.

    Inputs may be f32 or bf16 (bf16 halves HBM traffic; compute is f32 in-kernel).
    `tile_rows` overrides the auto-selected batch tile (mainly for testing).
    """
    assert anchor.shape == positive.shape == negative.shape
    assert anchor.ndim == 2, "expected (B, D) embeddings"
    B, D = anchor.shape
    itemsize = jnp.dtype(anchor.dtype).itemsize

    TB = int(tile_rows) if tile_rows is not None else _choose_tile_rows(B, D, itemsize)
    TB = min(TB, B)
    num_tiles = pl.cdiv(B, TB)

    kernel = functools.partial(
        _triplet_kernel,
        margin=float(margin),
        batch=B,
        tile_rows=TB,
    )

    # Scoped VMEM limit: cover the pipelined input footprint (v5e default is
    # only 16 MiB), but stay inside v7x's 64 MiB physical VMEM.
    footprint = 3 * 2 * TB * D * itemsize
    vmem_limit = int(min(max(footprint + (2 << 20), 16 << 20), 48 << 20))

    result = pl.pallas_call(
        kernel,
        out_shape=jax.ShapeDtypeStruct((1, 1), jnp.float32),
        grid=(num_tiles,),
        in_specs=[
            pl.BlockSpec((TB, D), lambda i: (i, 0)),
            pl.BlockSpec((TB, D), lambda i: (i, 0)),
            pl.BlockSpec((TB, D), lambda i: (i, 0)),
        ],
        # Same (1,1) block every step -> resident accumulator, written back once.
        out_specs=pl.BlockSpec((1, 1), lambda i: (0, 0)),
        compiler_params=pltpu.CompilerParams(
            dimension_semantics=("arbitrary",),  # reduction axis
            vmem_limit_bytes=vmem_limit,
        ),
    )(anchor, positive, negative)

    return result[0, 0]


def _reference(anchor, positive, negative, margin=0.5):
    a = anchor.astype(jnp.float32)
    p = positive.astype(jnp.float32)
    n = negative.astype(jnp.float32)

    def cos(x, y):
        num = jnp.sum(x * y, axis=1)
        den = jnp.maximum(
            jnp.linalg.norm(x, axis=1) * jnp.linalg.norm(y, axis=1), _EPS
        )
        return num / den

    loss = jnp.maximum(cos(a, n) - cos(a, p) + margin, 0.0)
    return jnp.mean(loss)


if __name__ == "__main__":
    key = jax.random.PRNGKey(0)
    k1, k2, k3, k4, k5, k6 = jax.random.split(key, 6)

    # Case 1: small lane-aligned batch, single full-array block.
    B1, D1 = 8, 128
    a1 = jax.random.normal(k1, (B1, D1), dtype=jnp.float32)
    p1 = jax.random.normal(k2, (B1, D1), dtype=jnp.float32)
    n1 = jax.random.normal(k3, (B1, D1), dtype=jnp.float32)

    out1 = jax.block_until_ready(triplet_loss(a1, p1, n1, margin=0.5))
    ref1 = _reference(a1, p1, n1, margin=0.5)
    assert jnp.allclose(out1, ref1, atol=1e-5, rtol=1e-5), (out1, ref1)

    # Case 2: batch not a multiple of the tile -> exercises the multi-step
    # accumulator grid and final-tile masking (tile_rows forced to 8).
    B2, D2 = 20, 256
    a2 = jax.random.normal(k4, (B2, D2), dtype=jnp.float32)
    p2 = jax.random.normal(k5, (B2, D2), dtype=jnp.float32)
    n2 = jax.random.normal(k6, (B2, D2), dtype=jnp.float32)

    out2 = jax.block_until_ready(triplet_loss(a2, p2, n2, margin=0.5, tile_rows=8))
    ref2 = _reference(a2, p2, n2, margin=0.5)
    assert jnp.allclose(out2, ref2, atol=1e-5, rtol=1e-5), (out2, ref2)

    print("KERNEL_OK")
</pallas_src>

<mosaic_0001>
module attributes {stable_mosaic.version = 11 : i64} {
  func.func @_triplet_kernel(%arg0: i32, %arg1: memref<8x128xf32, #tpu.memory_space<vmem>>, %arg2: memref<8x128xf32, #tpu.memory_space<vmem>>, %arg3: memref<8x128xf32, #tpu.memory_space<vmem>>, %arg4: memref<1x1xf32, #tpu.memory_space<vmem>>) attributes {dimension_semantics = [#tpu.dimension_semantics<arbitrary>], iteration_bounds = array<i64: 1>, scalar_prefetch = 0 : i64, scratch_operands = 0 : i64, tpu.core_type = #tpu.core_type<tc>, window_params = [{transform_indices = @transform_0, window_bounds = array<i64: 8, 128>}, {transform_indices = @transform_1, window_bounds = array<i64: 8, 128>}, {transform_indices = @transform_2, window_bounds = array<i64: 8, 128>}, {pipeline_mode = #tpu.pipeline_mode<synchronous>, transform_indices = @transform_3, window_bounds = array<i64: 1, 1>}]} {
    %c0_i32 = arith.constant 0 : i32
    %0 = arith.cmpi eq, %arg0, %c0_i32 : i32
    %1 = arith.extui %0 : i1 to i32
    %c0_i32_0 = arith.constant 0 : i32
    %2 = arith.cmpi ne, %1, %c0_i32_0 : i32
    scf.if %2 {
      %cst_23 = arith.constant 0.000000e+00 : f32
      %52 = vector.broadcast %cst_23 : f32 to vector<1x1xf32>
      %c0_24 = arith.constant 0 : index
      %c0_25 = arith.constant 0 : index
      %53 = vector.load %arg4[%c0_24, %c0_25] : memref<1x1xf32, #tpu.memory_space<vmem>>, vector<1x1xf32>
      tpu.vector_store %arg4[%c0_24, %c0_25], %52 {strides = array<i32>} : memref<1x1xf32, #tpu.memory_space<vmem>>, vector<1x1xf32>,
    } else {
    }
    %c0 = arith.constant 0 : index
    %c0_1 = arith.constant 0 : index
    %3 = vector.load %arg1[%c0, %c0_1] : memref<8x128xf32, #tpu.memory_space<vmem>>, vector<8x128xf32>
    %c0_2 = arith.constant 0 : index
    %c0_3 = arith.constant 0 : index
    %4 = vector.load %arg2[%c0_2, %c0_3] : memref<8x128xf32, #tpu.memory_space<vmem>>, vector<8x128xf32>
    %c0_4 = arith.constant 0 : index
    %c0_5 = arith.constant 0 : index
    %5 = vector.load %arg3[%c0_4, %c0_5] : memref<8x128xf32, #tpu.memory_space<vmem>>, vector<8x128xf32>
    %6 = arith.mulf %3, %3 : vector<8x128xf32>
    %cst = arith.constant dense<0.000000e+00> : vector<8xf32>
    %7 = vector.multi_reduction <add>, %6, %cst [1] : vector<8x128xf32> to vector<8xf32>
    %8 = vector.shape_cast %7 : vector<8xf32> to vector<8x1xf32>
    %9 = arith.mulf %4, %4 : vector<8x128xf32>
    %cst_6 = arith.constant dense<0.000000e+00> : vector<8xf32>
    %10 = vector.multi_reduction <add>, %9, %cst_6 [1] : vector<8x128xf32> to vector<8xf32>
    %11 = vector.shape_cast %10 : vector<8xf32> to vector<8x1xf32>
    %12 = arith.mulf %5, %5 : vector<8x128xf32>
    %cst_7 = arith.constant dense<0.000000e+00> : vector<8xf32>
    %13 = vector.multi_reduction <add>, %12, %cst_7 [1] : vector<8x128xf32> to vector<8xf32>
    %14 = vector.shape_cast %13 : vector<8xf32> to vector<8x1xf32>
    %15 = arith.mulf %3, %4 : vector<8x128xf32>
    %cst_8 = arith.constant dense<0.000000e+00> : vector<8xf32>
    %16 = vector.multi_reduction <add>, %15, %cst_8 [1] : vector<8x128xf32> to vector<8xf32>
    %17 = vector.shape_cast %16 : vector<8xf32> to vector<8x1xf32>
    %18 = arith.mulf %3, %5 : vector<8x128xf32>
    %cst_9 = arith.constant dense<0.000000e+00> : vector<8xf32>
    %19 = vector.multi_reduction <add>, %18, %cst_9 [1] : vector<8x128xf32> to vector<8xf32>
    %20 = vector.shape_cast %19 : vector<8xf32> to vector<8x1xf32>
    %21 = arith.mulf %8, %11 : vector<8x1xf32>
    %cst_10 = arith.constant 1.000000e-16 : f32
    %22 = vector.broadcast %cst_10 : f32 to vector<8x1xf32>
    %23 = arith.maximumf %21, %22 : vector<8x1xf32>
    %24 = math.rsqrt %23 : vector<8x1xf32>
    %25 = arith.mulf %17, %24 : vector<8x1xf32>
    %26 = arith.mulf %8, %14 : vector<8x1xf32>
    %cst_11 = arith.constant 1.000000e-16 : f32
    %27 = vector.broadcast %cst_11 : f32 to vector<8x1xf32>
    %28 = arith.maximumf %26, %27 : vector<8x1xf32>
    %29 = math.rsqrt %28 : vector<8x1xf32>
    %30 = arith.mulf %20, %29 : vector<8x1xf32>
    %31 = arith.subf %30, %25 : vector<8x1xf32>
    %cst_12 = arith.constant 5.000000e-01 : f32
    %32 = vector.broadcast %cst_12 : f32 to vector<8x1xf32>
    %33 = arith.addf %31, %32 : vector<8x1xf32>
    %cst_13 = arith.constant 0.000000e+00 : f32
    %34 = vector.broadcast %cst_13 : f32 to vector<8x1xf32>
    %35 = arith.maximumf %33, %34 : vector<8x1xf32>
    %36 = tpu.iota {dimensions = array<i32: 0>} : vector<8x1xi32>
    %c8_i32 = arith.constant 8 : i32
    %37 = arith.muli %arg0, %c8_i32 : i32
    %38 = vector.broadcast %37 : i32 to vector<8x1xi32>
    %39 = arith.addi %38, %36 : vector<8x1xi32>
    %c8_i32_14 = arith.constant 8 : i32
    %40 = vector.broadcast %c8_i32_14 : i32 to vector<8x1xi32>
    %41 = arith.cmpi slt, %39, %40 : vector<8x1xi32>
    %cst_15 = arith.constant 0.000000e+00 : f32
    %42 = vector.broadcast %cst_15 : f32 to vector<8x1xf32>
    %43 = arith.select %41, %35, %42 : vector<8x1xi1>, vector<8x1xf32>
    %c0_16 = arith.constant 0 : index
    %c0_17 = arith.constant 0 : index
    %44 = vector.load %arg4[%c0_16, %c0_17] : memref<1x1xf32, #tpu.memory_space<vmem>>, vector<1x1xf32>
    %cst_18 = arith.constant dense<0.000000e+00> : vector<1xf32>
    %45 = vector.multi_reduction <add>, %43, %cst_18 [0] : vector<8x1xf32> to vector<1xf32>
    %46 = vector.shape_cast %45 : vector<1xf32> to vector<1x1xf32>
    %47 = arith.addf %44, %46 : vector<1x1xf32>
    %c0_19 = arith.constant 0 : index
    %c0_20 = arith.constant 0 : index
    %48 = vector.load %arg4[%c0_19, %c0_20] : memref<1x1xf32, #tpu.memory_space<vmem>>, vector<1x1xf32>
    tpu.vector_store %arg4[%c0_19, %c0_20], %47 {strides = array<i32>} : memref<1x1xf32, #tpu.memory_space<vmem>>, vector<1x1xf32>,
    %c0_i32_21 = arith.constant 0 : i32
    %49 = arith.cmpi eq, %arg0, %c0_i32_21 : i32
    %50 = arith.extui %49 : i1 to i32
    %c0_i32_22 = arith.constant 0 : i32
    %51 = arith.cmpi ne, %50, %c0_i32_22 : i32
    scf.if %51 {
      %c0_23 = arith.constant 0 : index
      %c0_24 = arith.constant 0 : index
      %52 = vector.load %arg4[%c0_23, %c0_24] : memref<1x1xf32, #tpu.memory_space<vmem>>, vector<1x1xf32>
      %cst_25 = arith.constant 1.250000e-01 : f32
      %53 = vector.broadcast %cst_25 : f32 to vector<1x1xf32>
      %54 = arith.mulf %52, %53 : vector<1x1xf32>
      %c0_26 = arith.constant 0 : index
      %c0_27 = arith.constant 0 : index
      %55 = vector.load %arg4[%c0_26, %c0_27] : memref<1x1xf32, #tpu.memory_space<vmem>>, vector<1x1xf32>
      tpu.vector_store %arg4[%c0_26, %c0_27], %54 {strides = array<i32>} : memref<1x1xf32, #tpu.memory_space<vmem>>, vector<1x1xf32>,
    } else {
    }
    return
  }
  func.func @transform_0(%arg0: i32) -> (i32, i32) {
    %c0_i32 = arith.constant 0 : i32
    %c0_i32_0 = arith.constant 0 : i32
    return %arg0, %c0_i32 : i32, i32
  }
  func.func @transform_1(%arg0: i32) -> (i32, i32) {
    %c0_i32 = arith.constant 0 : i32
    %c0_i32_0 = arith.constant 0 : i32
    return %arg0, %c0_i32 : i32, i32
  }
  func.func @transform_2(%arg0: i32) -> (i32, i32) {
    %c0_i32 = arith.constant 0 : i32
    %c0_i32_0 = arith.constant 0 : i32
    return %arg0, %c0_i32 : i32, i32
  }
  func.func @transform_3(%arg0: i32) -> (i32, i32) {
    %c0_i32 = arith.constant 0 : i32
    %c0_i32_0 = arith.constant 0 : i32
    %c0_i32_1 = arith.constant 0 : i32
    return %c0_i32, %c0_i32_0 : i32, i32
  }
}

</mosaic_0001>

<bundles_post_ra>
// kernel: tpu_custom_call.1
= control target key start
LH: loop header
LB: loop body
LE: loop exit
PB: predicated region body
PF: predicated region fallthrough
CT: control target
= control target key end

     0   :  { %8 = vsyncpa [#allocation3], 0  ;;  %s259_s0 = inlined_call_operand.hbm [shape: f32[8,128], index: 0, kind: input, shape index: {}]   ;;  %s260_s1 = inlined_call_operand.hbm [shape: f32[8,128], index: 1, kind: input, shape index: {}]   ;;  %s261_s2 = inlined_call_operand.hbm [shape: f32[8,128], index: 2, kind: input, shape index: {}]   ;;  %s262_s3 = inlined_call_operand.hbm [shape: f32[1,1], index: 3, kind: output, shape index: {}]  }
   0x1   :  { %9 = vsyncpa [#allocation6], 0 }
   0x2   :  { %10 = vsyncpa [#allocation4], 0  ;;  %s219_s12 = smov [#allocation5]   ;;  %s220_s14 = smov [#allocation2]  }
   0x3   :  { %s27_s13 = sshll.u32 %s219_s12, 4  ;;  %s17_s15 = sshll.u32 %s220_s14, 4  ;;  %s28_s13 = int_to_ptr.vmem [resolvable:$true] %s27_s13  ;;  %s18_s15 = int_to_ptr.vmem [resolvable:$true] %s17_s15 }
   0x4   :  { %s141_s16 = scalar_lea.vmem %s28_s13, 128  ;;  %p146_p1 = scmp.lt.s32.totalorder %s28_s13, %s28_s13 }
   0x5   :  { %p142_p0 = scmp.ne.s32.totalorder %s28_s13, %s141_s16  ;;  %p147_p2 = scmp.lt.s32.totalorder %s141_s16, %s141_s16 }
   0x7   :  { %p148_p3 = por %p147_p2, %p146_p1 }
   0x9   :  { %p149_p4 = pnand %p148_p3, %p142_p0 }
   0xb   :  { %152 = shalt.err (!%p149_p4)
}
   0xc   :  { %30 = dma.hbm_to_vmem [thread:$0]  %s260_s1, 128, %s28_s13, [#allocation6]  }
   0xd   :  { %s161_s19 = scalar_lea.vmem %s18_s15, 128  ;;  %p166_p6 = scmp.lt.s32.totalorder %s18_s15, %s18_s15 }
   0xe   :  { %p162_p5 = scmp.ne.s32.totalorder %s18_s15, %s161_s19  ;;  %p167_p7 = scmp.lt.s32.totalorder %s161_s19, %s161_s19 }
  0x10   :  { %p168_p8 = por %p167_p7, %p166_p6 }
  0x12   :  { %p169_p9 = pnand %p168_p8, %p162_p5 }
  0x14   :  { %172 = shalt.err (!%p169_p9)
}
  0x15   :  { %20 = dma.hbm_to_vmem [thread:$0]  %s259_s0, 128, %s18_s15, [#allocation3]  }
  0x16   :  { %s221_s22 = smov [#allocation7]  }
  0x17   :  { %s37_s23 = sshll.u32 %s221_s22, 4  ;;  %s38_s23 = int_to_ptr.vmem [resolvable:$true] %s37_s23 }
  0x18   :  { %s181_s24 = scalar_lea.vmem %s38_s23, 128  ;;  %p186_p11 = scmp.lt.s32.totalorder %s38_s23, %s38_s23 }
  0x19   :  { %p182_p10 = scmp.ne.s32.totalorder %s38_s23, %s181_s24  ;;  %p187_p12 = scmp.lt.s32.totalorder %s181_s24, %s181_s24 }
  0x1b   :  { %p188_p13 = por %p187_p12, %p186_p11 }
  0x1d   :  { %p189_p0 = pnand %p188_p13, %p182_p10 }
  0x1f   :  { %192 = shalt.err (!%p189_p0)
}
  0x20   :  { %40 = dma.hbm_to_vmem [thread:$0]  %s261_s2, 128, %s38_s23, [#allocation6]  }
  0x21   :  { %213 = dma.done.wait [#allocation3], 128  }
  0x22   :  { %214 = vsyncadd [#allocation3], 4294967168 }
  0x23   :  { %215 = dma.done.wait [#allocation6], 256  }
  0x24   :  { %216 = vsyncadd [#allocation6], 4294967040  ;;  %v58_v0 = vld [vmem:[#allocation7] sm:$0xff]  ;;  %v56_v1 = vld [vmem:[#allocation2] sm:$0xff]  ;;  %vm54_vm0 = vcmask 0   ;;  %v222_v8 = vmov 0.0  }
  0x25   :  { %v57_v2 = vld [vmem:[#allocation5] sm:$0xff]  ;;  %v65_v3 = vmul.f32 %v58_v0, %v58_v0  ;;  %v59_v4 = vmul.f32 %v56_v1, %v56_v1  ;;  %v71_v7 = vmul.f32 %v58_v0, %v56_v1  ;;  %55 = vst.msk [vmem:[#allocation8] sm:$0x1] %vm54_vm0, %v222_v8  ;;  %s223_s0 = smov [#allocation8]  }
  0x26   :  { %v62_v5 = vmul.f32 %v57_v2, %v57_v2  ;;  %v68_v6 = vmul.f32 %v57_v2, %v56_v1  ;;  %s114_s2 = sshll.u32 %s223_s0, 4  ;;  %s115_s2 = int_to_ptr.vmem [resolvable:$true] %s114_s2 }
  0x27   :  { %66 = vadd.xlane.f32.xlu1 %v65_v3  ;;  %60 = vadd.xlane.f32.xlu0 %v59_v4  ;;  %s193_s26 = scalar_lea.vmem %s115_s2, 16  ;;  %s197_s27 = scalar_lea.vmem %s115_s2, 32 }
  0x28   :  { %p194_p1 = scmp.ne.s32.totalorder %s115_s2, %s193_s26  ;;  %p198_p2 = scmp.lt.s32.totalorder %s115_s2, %s115_s2 }
  0x29   :  { %p199_p3 = scmp.lt.s32.totalorder %s197_s27, %s193_s26 }
  0x2b   :  { %63 = vadd.xlane.f32.xlu0 %v62_v5  ;;  %69 = vadd.xlane.f32.xlu1 %v68_v6  ;;  %p200_p4 = por %p199_p3, %p198_p2 }
  0x2c   :  { %v92_v30 = vld [vmem:[#allocation8] sm:$0x1] }
  0x2d   :  { %p201_p5 = pnand %p200_p4, %p194_p1 }
  0x2f   :  { %72 = vadd.xlane.f32.xlu0 %v71_v7 }
  0xb0   :  { %v67_v9 = vpop.xlane.xlu1 %66  ;;  %v61_v10 = vpop.xlane.xlu0 %60 }
  0xb1   :  { %v78_v11 = vmul.f32 %v67_v9, %v61_v10 }
  0xb3   :  { %v79_v12 = vmax.f32 %v78_v11, 1e-16 }
  0xb4   :  { %v64_v13 = vpop.xlane.xlu0 %63  ;;  %v70_v18 = vpop.xlane.xlu1 %69 }
  0xb5   :  { %v74_v14 = vmul.f32 %v64_v13, %v61_v10  ;;  %129 = vrsqrt.f32 %v79_v12 }
  0xb7   :  { %v75_v15 = vmax.f32 %v74_v14, 1e-16 }
  0xb8   :  { %v73_v17 = vpop.xlane.xlu0 %72 }
  0xb9   :  { %131 = vrsqrt.f32 %v75_v15 }
  0xc2   :  { %v130_v16 = vpop.eup %129 }
  0xc3   :  { %v81_v20 = vmul.f32 %v130_v16, %v73_v17 }
  0xc6   :  { %v132_v19 = vpop.eup %131 }
  0xc7   :  { %v77_v21 = vmul.f32 %v132_v19, %v70_v18 }
  0xc9   :  { %v82_v22 = vsub.f32 %v81_v20, %v77_v21 }
  0xcb   :  { %v83_v23 = vadd.f32 0.5, %v82_v22 }
  0xcd   :  { %v84_v24 = vmax.f32 %v83_v23, 0.0 }
  0xcf   :  { %v93_v25 = vrot.slane %v84_v24, 4 }
  0xd1   :  { %v94_v26 = vadd.f32 %v93_v25, %v84_v24 }
  0xd3   :  { %v95_v27 = vrot.slane %v94_v26, 2 }
  0xd5   :  { %v96_v28 = vadd.f32 %v95_v27, %v94_v26 }
  0xd7   :  { %v97_v29 = vrot.slane %v96_v28, 1 }
  0xd9   :  { %v98_v31 = vadd.f32 %v97_v29, %v96_v28 }
  0xdb   :  { %v99_v32 = vadd.f32 %v98_v31, %v92_v30 }
  0xdd   :  { %101 = vst.msk [vmem:[#allocation8] sm:$0x1] %vm54_vm0, %v99_v32 }
  0xe4   :  { %v105_v33 = vld [vmem:[#allocation8] sm:$0x1] }
  0xe5   :  { %v106_v34 = vmul.f32 0.125, %v105_v33 }
  0xe7   :  { %107 = vst.msk [vmem:[#allocation8] sm:$0x1] %vm54_vm0, %v106_v34 }
  0xe8   :  { %204 = shalt.err (!%p201_p5)
}
  0xe9   :  { %117 = dma.vmem_to_hbm [thread:$0]  %s115_s2, 16, %s262_s3, [#allocation4]  }
  0xea   :  { %217 = dma.done.wait [#allocation4], 16  }
  0xeb   :  { %218 = vsyncadd [#allocation4], 4294967280 }
  0xec   :  { %121 = vsyncpa [#allocation3], 1 }
  0xed   :  { %122 = vsyncpa [#allocation6], 1 }
  0xee   :  { %123 = vsyncpa [#allocation4], 1 }

</bundles_post_ra>
